<compile_context>
chip_gen: v5e
topology: v5e:2x2
jax: 0.10.0
libtpu: 0.0.40
codegen_flags: <defaults>
</compile_context>

<pallas_src>
import jax
import jax.numpy as jnp
from jax.experimental import pallas as pl
from jax.experimental.pallas import tpu as pltpu

EPS = 1e-5

ROW_BLK_MAX = 256                     # sublane rows per tile
STATS_TILE_BYTES = 8 * 1024 * 1024    # target x-tile bytes, stats pass
APPLY_TILE_BYTES = 4 * 1024 * 1024    # target x/out-tile bytes, apply pass
APPLY_LANE_MAX = 64 * 128             # bounds the unrolled column loop in the apply kernel
VMEM_LIMIT_BYTES = 48 * 1024 * 1024   # < v7x 64 MiB physical VMEM; ample on v5e/v6e


def _cdiv(a, b):
    return -(-a // b)


def _round_up(x, m):
    return _cdiv(x, m) * m


def _pick_block(total, max_blk, align):
    """Block size chosen by block count: bounds padding waste to < `align` per block."""
    n_blocks = _cdiv(total, max(max_blk, align))
    return _round_up(_cdiv(total, n_blocks), align)


# ----------------------------------------------------------------------------- kernels

def _make_stats_kernel(hw_blk, hw_total, n_hw):
    """Accumulate per-row sum / sum-of-squares over HW tiles of the (R, HW) view."""
    ragged = n_hw * hw_blk != hw_total
    valid = hw_total - (n_hw - 1) * hw_blk      # valid lanes in the last HW tile
    full_cols = (valid // 128) * 128            # fully-valid 128-lane prefix of that tile

    def kernel(x_ref, sum_ref, sq_ref):
        j = pl.program_id(1)

        @pl.when(j == 0)
        def _init():
            sum_ref[...] = jnp.zeros_like(sum_ref)
            sq_ref[...] = jnp.zeros_like(sq_ref)

        def accum(x):
            sum_ref[...] += jnp.sum(x, axis=1, keepdims=True)
            sq_ref[...] += jnp.sum(x * x, axis=1, keepdims=True)

        if not ragged:
            accum(x_ref[...])
        else:
            # Only the last HW tile contains garbage lanes; mask just its ragged tail
            # so interior tiles pay no extra VPU work.
            @pl.when(j < n_hw - 1)
            def _full_tile():
                accum(x_ref[...])

            @pl.when(j == n_hw - 1)
            def _edge_tile():
                if full_cols > 0:
                    accum(x_ref[:, :full_cols])
                tail = x_ref[:, full_cols:]
                lane = jax.lax.broadcasted_iota(jnp.int32, tail.shape, 1)
                accum(jnp.where(lane < (valid - full_cols), tail, 0.0))

    return kernel


def _make_apply_kernel(ncol):
    """o = A * x + B, per 128-lane column slice; A/B are lane-dense (row_blk, 128)."""

    def kernel(a_ref, b_ref, x_ref, o_ref):
        a = a_ref[...]
        b = b_ref[...]
        for c in range(ncol):                       # static unroll, ncol <= 64
            sl = slice(c * 128, (c + 1) * 128)
            o_ref[:, sl] = a * x_ref[:, sl] + b

    return kernel


# ----------------------------------------------------------------------------- wrapper

def adain2d(x, s, params, eps=EPS):
    """x: (N, C, H, W) f32, s: (N, style_dim) f32."""
    N, C, H, W = x.shape
    HW = H * W
    R = N * C

    # ---- tiling (no wrapper-side padding; ragged edges handled by cdiv grids) ----
    row_blk = _pick_block(R, ROW_BLK_MAX, 8)
    # v7x megacore: the stats pass only shards its "parallel" row axis, so split it
    # into >= 2 blocks whenever R allows (near-free elsewhere: byte budget keeps tiles
    # the same size).
    if R >= 16 and _cdiv(R, row_blk) < 2:
        row_blk = _round_up(_cdiv(R, 2), 8)
    n_row = _cdiv(R, row_blk)

    hw_max_s = max(128, (STATS_TILE_BYTES // (row_blk * 4)) // 128 * 128)
    hw_blk_s = _pick_block(HW, hw_max_s, 128)
    n_hw_s = _cdiv(HW, hw_blk_s)

    hw_max_a = max(128, min(APPLY_LANE_MAX,
                            (APPLY_TILE_BYTES // (row_blk * 4)) // 128 * 128))
    hw_blk_a = _pick_block(HW, hw_max_a, 128)
    n_hw_a = _cdiv(HW, hw_blk_a)

    x2 = x.reshape(R, HW)   # free: contiguous merge of (N,C) and (H,W)

    # ---- pass 1: per-(n,c) sum / sum-of-squares over HW (tiled, pipelined) ----
    sums, sqs = pl.pallas_call(
        _make_stats_kernel(hw_blk_s, HW, n_hw_s),
        out_shape=(
            jax.ShapeDtypeStruct((R, 1), jnp.float32),
            jax.ShapeDtypeStruct((R, 1), jnp.float32),
        ),
        grid_spec=pltpu.PrefetchScalarGridSpec(
            num_scalar_prefetch=0,
            grid=(n_row, n_hw_s),
            in_specs=[pl.BlockSpec((row_blk, hw_blk_s), lambda i, j: (i, j))],
            out_specs=[
                pl.BlockSpec((row_blk, 1), lambda i, j: (i, 0)),
                pl.BlockSpec((row_blk, 1), lambda i, j: (i, 0)),
            ],
        ),
        compiler_params=pltpu.CompilerParams(
            dimension_semantics=("parallel", "arbitrary"),
            vmem_limit_bytes=VMEM_LIMIT_BYTES,
        ),
    )(x2)

    # ---- finalize stats + style FC + fold into per-row affine (tiny, plain XLA) ----
    in_mean = (sums[:, 0] / HW).reshape(N, C)
    in_sqm = (sqs[:, 0] / HW).reshape(N, C)
    in_var = jnp.maximum(in_sqm - in_mean * in_mean, 0.0)

    # Every sample has the same H*W, so batch moments = mean of per-instance moments.
    bn_mean = jnp.mean(in_mean, axis=0, keepdims=True)    # (1, C)
    bn_sqm = jnp.mean(in_sqm, axis=0, keepdims=True)
    bn_var = jnp.maximum(bn_sqm - bn_mean * bn_mean, 0.0)

    r_in = jax.lax.rsqrt(in_var + eps)                    # (N, C)
    r_bn = jax.lax.rsqrt(bn_var + eps)                    # (1, C)

    h = s @ params["fc_w"].T + params["fc_b"]             # (N, 2C)
    gamma, beta = h[:, :C], h[:, C:]

    gate = params["gate"][None, :]                        # (1, C)  BIN gate rho
    w = params["weight"][None, :]
    b = params["bias"][None, :]

    scale = w * (gate * r_bn + (1.0 - gate) * r_in)                           # (N, C)
    shift = b - w * (gate * bn_mean * r_bn + (1.0 - gate) * in_mean * r_in)   # (N, C)
    A = (1.0 + gamma) * scale                                                 # (N, C)
    B = (1.0 + gamma) * shift + beta                                          # (N, C)

    # Lane-dense (R, 128) so the apply kernel never lane-broadcasts (HBM cost ~R*512B).
    A2 = jnp.broadcast_to(A.reshape(R, 1).astype(jnp.float32), (R, 128))
    B2 = jnp.broadcast_to(B.reshape(R, 1).astype(jnp.float32), (R, 128))

    # ---- pass 2: o = A * x + B (tiled, pipelined, lane-dense stores) ----
    # A2/B2 index_map is (i, 0): constant along the fastest grid axis (j), so they are
    # not re-DMA'd per HW tile.  Ragged row/lane edges: OOB output stores are dropped.
    out = pl.pallas_call(
        _make_apply_kernel(hw_blk_a // 128),
        out_shape=jax.ShapeDtypeStruct((R, HW), x.dtype),
        grid_spec=pltpu.PrefetchScalarGridSpec(
            num_scalar_prefetch=0,
            grid=(n_row, n_hw_a),
            in_specs=[
                pl.BlockSpec((row_blk, 128), lambda i, j: (i, 0)),
                pl.BlockSpec((row_blk, 128), lambda i, j: (i, 0)),
                pl.BlockSpec((row_blk, hw_blk_a), lambda i, j: (i, j)),
            ],
            out_specs=pl.BlockSpec((row_blk, hw_blk_a), lambda i, j: (i, j)),
        ),
        compiler_params=pltpu.CompilerParams(
            dimension_semantics=("parallel", "parallel"),
            vmem_limit_bytes=VMEM_LIMIT_BYTES,
        ),
    )(A2, B2, x2)

    return out.reshape(N, C, H, W)


# ----------------------------------------------------------------------------- reference

def adain2d_ref(x, s, params):
    """Pure-JAX reference mirroring the PyTorch forward (training mode)."""
    h = s @ params["fc_w"].T + params["fc_b"]              # (N, 2C)
    C = x.shape[1]
    gamma = h[:, :C][:, :, None, None]
    beta = h[:, C:][:, :, None, None]
    bn_mean = jnp.mean(x, axis=(0, 2, 3), keepdims=True)
    bn_var = jnp.var(x, axis=(0, 2, 3), keepdims=True)
    in_mean = jnp.mean(x, axis=(2, 3), keepdims=True)
    in_var = jnp.var(x, axis=(2, 3), keepdims=True)
    x_bn = (x - bn_mean) / jnp.sqrt(bn_var + EPS)
    x_in = (x - in_mean) / jnp.sqrt(in_var + EPS)
    gate = params["gate"][None, :, None, None]
    w = params["weight"][None, :, None, None]
    b = params["bias"][None, :, None, None]
    normed = gate * w * x_bn + (1.0 - gate) * w * x_in + b
    return (1.0 + gamma) * normed + beta


# ----------------------------------------------------------------------------- test

def _run_case(N, C, H, W, style_dim, seed):
    key = jax.random.PRNGKey(seed)
    kx, ks, kw, kb, kg, kgw, kgb = jax.random.split(key, 7)

    x = jax.random.normal(kx, (N, C, H, W), dtype=jnp.float32)
    s = jax.random.normal(ks, (N, style_dim), dtype=jnp.float32)

    # Deterministic synthetic parameters (shapes match the PyTorch module's __init__).
    params = {
        "fc_w": jax.random.normal(kw, (2 * C, style_dim), dtype=jnp.float32) * 0.1,
        "fc_b": jax.random.normal(kb, (2 * C,), dtype=jnp.float32) * 0.1,
        "gate": jax.random.uniform(kg, (C,), dtype=jnp.float32),            # BIN gate rho
        "weight": 1.0 + 0.1 * jax.random.normal(kgw, (C,), dtype=jnp.float32),
        "bias": 0.1 * jax.random.normal(kgb, (C,), dtype=jnp.float32),
    }

    out = jax.block_until_ready(adain2d(x, s, params))
    ref = adain2d_ref(x, s, params)
    assert out.shape == (N, C, H, W)
    err = float(jnp.max(jnp.abs(out - ref)))
    assert err < 1e-4, f"mismatch vs pure-JAX reference (shape {(N, C, H, W)}): {err}"


if __name__ == "__main__":
    _run_case(2, 4, 16, 16, 32, 0)   # aligned HW (256 lanes), R = 8
    _run_case(3, 4, 10, 10, 32, 1)   # ragged rows (R = 12) and ragged lanes (HW = 100)
    print("KERNEL_OK")
</pallas_src>

<mosaic_0001>
module attributes {stable_mosaic.version = 11 : i64} {
  func.func @kernel(%arg0: i32, %arg1: i32, %arg2: memref<8x256xf32, #tpu.memory_space<vmem>>, %arg3: memref<8x1xf32, #tpu.memory_space<vmem>>, %arg4: memref<8x1xf32, #tpu.memory_space<vmem>>) attributes {dimension_semantics = [#tpu.dimension_semantics<parallel>, #tpu.dimension_semantics<arbitrary>], iteration_bounds = array<i64: 1, 1>, scalar_prefetch = 0 : i64, scratch_operands = 0 : i64, tpu.core_type = #tpu.core_type<tc>, window_params = [{transform_indices = @transform_0, window_bounds = array<i64: 8, 256>}, {transform_indices = @transform_1, window_bounds = array<i64: 8, 1>}, {transform_indices = @transform_2, window_bounds = array<i64: 8, 1>}]} {
    %c0_i32 = arith.constant 0 : i32
    %0 = arith.cmpi eq, %arg1, %c0_i32 : i32
    %1 = arith.extui %0 : i1 to i32
    %c0_i32_0 = arith.constant 0 : i32
    %2 = arith.cmpi ne, %1, %c0_i32_0 : i32
    scf.if %2 {
      %cst_11 = arith.constant 0.000000e+00 : f32
      %15 = vector.broadcast %cst_11 : f32 to vector<8x1xf32>
      %c0_12 = arith.constant 0 : index
      %c0_13 = arith.constant 0 : index
      %16 = vector.load %arg3[%c0_12, %c0_13] : memref<8x1xf32, #tpu.memory_space<vmem>>, vector<8x1xf32>
      tpu.vector_store %arg3[%c0_12, %c0_13], %15 {strides = array<i32>} : memref<8x1xf32, #tpu.memory_space<vmem>>, vector<8x1xf32>,
      %cst_14 = arith.constant 0.000000e+00 : f32
      %17 = vector.broadcast %cst_14 : f32 to vector<8x1xf32>
      %c0_15 = arith.constant 0 : index
      %c0_16 = arith.constant 0 : index
      %18 = vector.load %arg4[%c0_15, %c0_16] : memref<8x1xf32, #tpu.memory_space<vmem>>, vector<8x1xf32>
      tpu.vector_store %arg4[%c0_15, %c0_16], %17 {strides = array<i32>} : memref<8x1xf32, #tpu.memory_space<vmem>>, vector<8x1xf32>,
    } else {
    }
    %c0 = arith.constant 0 : index
    %c0_1 = arith.constant 0 : index
    %3 = vector.load %arg2[%c0, %c0_1] : memref<8x256xf32, #tpu.memory_space<vmem>>, vector<8x256xf32>
    %c0_2 = arith.constant 0 : index
    %c0_3 = arith.constant 0 : index
    %4 = vector.load %arg3[%c0_2, %c0_3] : memref<8x1xf32, #tpu.memory_space<vmem>>, vector<8x1xf32>
    %cst = arith.constant dense<0.000000e+00> : vector<8xf32>
    %5 = vector.multi_reduction <add>, %3, %cst [1] : vector<8x256xf32> to vector<8xf32>
    %6 = vector.shape_cast %5 : vector<8xf32> to vector<8x1xf32>
    %7 = arith.addf %4, %6 : vector<8x1xf32>
    %c0_4 = arith.constant 0 : index
    %c0_5 = arith.constant 0 : index
    %8 = vector.load %arg3[%c0_4, %c0_5] : memref<8x1xf32, #tpu.memory_space<vmem>>, vector<8x1xf32>
    tpu.vector_store %arg3[%c0_4, %c0_5], %7 {strides = array<i32>} : memref<8x1xf32, #tpu.memory_space<vmem>>, vector<8x1xf32>,
    %c0_6 = arith.constant 0 : index
    %c0_7 = arith.constant 0 : index
    %9 = vector.load %arg4[%c0_6, %c0_7] : memref<8x1xf32, #tpu.memory_space<vmem>>, vector<8x1xf32>
    %10 = arith.mulf %3, %3 : vector<8x256xf32>
    %cst_8 = arith.constant dense<0.000000e+00> : vector<8xf32>
    %11 = vector.multi_reduction <add>, %10, %cst_8 [1] : vector<8x256xf32> to vector<8xf32>
    %12 = vector.shape_cast %11 : vector<8xf32> to vector<8x1xf32>
    %13 = arith.addf %9, %12 : vector<8x1xf32>
    %c0_9 = arith.constant 0 : index
    %c0_10 = arith.constant 0 : index
    %14 = vector.load %arg4[%c0_9, %c0_10] : memref<8x1xf32, #tpu.memory_space<vmem>>, vector<8x1xf32>
    tpu.vector_store %arg4[%c0_9, %c0_10], %13 {strides = array<i32>} : memref<8x1xf32, #tpu.memory_space<vmem>>, vector<8x1xf32>,
    return
  }
  func.func @transform_0(%arg0: i32, %arg1: i32) -> (i32, i32) {
    %c0_i32 = arith.constant 0 : i32
    return %arg0, %arg1 : i32, i32
  }
  func.func @transform_1(%arg0: i32, %arg1: i32) -> (i32, i32) {
    %c0_i32 = arith.constant 0 : i32
    %c0_i32_0 = arith.constant 0 : i32
    return %arg0, %c0_i32 : i32, i32
  }
  func.func @transform_2(%arg0: i32, %arg1: i32) -> (i32, i32) {
    %c0_i32 = arith.constant 0 : i32
    %c0_i32_0 = arith.constant 0 : i32
    return %arg0, %c0_i32 : i32, i32
  }
}

</mosaic_0001>

<bundles_post_ra>
// kernel: tpu_custom_call.1
= control target key start
LH: loop header
LB: loop body
LE: loop exit
PB: predicated region body
PF: predicated region fallthrough
CT: control target
= control target key end

     0   :  { %8 = vsyncpa [#allocation3], 0  ;;  %s85_s12 = smov [#allocation2]   ;;  %s127_s0 = inlined_call_operand.hbm [shape: f32[8,256], index: 0, kind: input, shape index: {}]   ;;  %s128_s1 = inlined_call_operand.vmem [shape: f32[8,1], index: 1, kind: output, shape index: {0}]   ;;  %s129_s2 = inlined_call_operand.vmem [shape: f32[8,1], index: 2, kind: output, shape index: {1}]  }
   0x1   :  { %s14_s11 = sshll.u32 %s127_s0, 4  ;;  %s16_s13 = sshll.u32 %s85_s12, 4  ;;  %s15_s11 = int_to_ptr.hbm [resolvable:$true] %s14_s11  ;;  %s17_s13 = int_to_ptr.vmem [resolvable:$true] %s16_s13 }
   0x2   :  { %19 = dma.hbm_to_vmem [thread:$0]  %s15_s11, 256, %s17_s13, [#allocation3]  }
   0x3   :  { %83 = dma.done.wait [#allocation3], 256  }
   0x4   :  { %84 = vsyncadd [#allocation3], 4294967040  ;;  %vm28_vm0 = vcmask 7168   ;;  %v86_v0 = vmov 0.0   ;;  %v31_v1 = vld [vmem:[#allocation2] sm:$0xff]  ;;  %v32_v2 = vld [vmem:[#allocation2 + $0x8] sm:$0xff] }
   0x5   :  { %29 = vst.msk [vmem:[%s128_s1] sm:$0xff] %vm28_vm0, %v86_v0  ;;  %v34_v3 = vadd.f32 %v32_v2, %v31_v1  ;;  %v41_v4 = vmul.f32 %v31_v1, %v31_v1  ;;  %v42_v5 = vmul.f32 %v32_v2, %v32_v2 }
   0x6   :  { %30 = vst.msk [vmem:[%s129_s2] sm:$0xff] %vm28_vm0, %v86_v0 }
   0x7   :  { %35 = vadd.xlane.f32.xlu0 %v34_v3  ;;  %v43_v6 = vadd.f32 %v42_v5, %v41_v4 }
   0xc   :  { %v33_v7 = vld [vmem:[%s128_s1] sm:$0xff] }
   0xd   :  { %v40_v10 = vld [vmem:[%s129_s2] sm:$0xff] }
   0xf   :  { %44 = vadd.xlane.f32.xlu0 %v43_v6 }
  0x7a   :  { %v36_v8 = vpop.xlane.xlu0 %35 }
  0x7b   :  { %v37_v9 = vadd.f32 %v36_v8, %v33_v7 }
  0x7d   :  { %39 = vst.msk [vmem:[%s128_s1] sm:$0xff] %vm28_vm0, %v37_v9 }
  0x82   :  { %v45_v11 = vpop.xlane.xlu0 %44 }
  0x83   :  { %v46_v12 = vadd.f32 %v45_v11, %v40_v10 }
  0x85   :  { %47 = vst.msk [vmem:[%s129_s2] sm:$0xff] %vm28_vm0, %v46_v12 }
  0x86   :  { %56 = vsyncpa [#allocation3], 1 }

</bundles_post_ra>
